<compile_context>
chip_gen: v7x
topology: tpu7x:2x2x1
jax: 0.10.0
libtpu: 0.0.40
codegen_flags: <defaults>
</compile_context>

<pallas_src>
import jax
import jax.numpy as jnp
from jax.experimental import pallas as pl
from jax.experimental.pallas import tpu as pltpu


def _round_up(x, m):
    return ((x + m - 1) // m) * m


def _rope_kernel(pos_ref, inv_ref, cos_ref, sin_ref):
    # pos_ref: (TN, 1)   f32
    # inv_ref: (1, dim)  f32  (= [inv_freq | inv_freq])
    # cos_ref/sin_ref: (TN, dim) out dtype
    freqs = pos_ref[...] * inv_ref[...]          # (TN, dim) broadcast outer product (VPU)
    cos_ref[...] = jnp.cos(freqs).astype(cos_ref.dtype)
    sin_ref[...] = jnp.sin(freqs).astype(sin_ref.dtype)


def make_inv_freq(dim, base=10000.0):
    # Same values as the PyTorch __init__ (int64 arange -> float), built in
    # f32 directly to avoid the x64-disabled downcast warning.
    return 1.0 / (base ** (jnp.arange(0, dim, 2, dtype=jnp.float32) / dim))


def _pick_tile(n, dim, out_bytes, tile_rows):
    # Budget ~8 MiB for the double-buffered pair of output tiles (2 outputs x
    # 2 buffers) -> safe under v5e's 16 MiB scoped-VMEM default and v7x's
    # smaller physical VMEM, while large enough to amortize the ~0.35 us
    # per-grid-step overhead (dim=128: 8192 rows bf16, 4096 rows f32).
    vmem_budget = 8 << 20
    bytes_per_row_buffered = 2 * 2 * dim * out_bytes
    tn_cap = max(8, (vmem_budget // bytes_per_row_buffered) // 8 * 8)
    tn_max = min(_round_up(tile_rows, 8), _round_up(n, 8), tn_cap)
    # Prefer a tile that divides n exactly (no pad / no un-pad slice).
    if n % 8 == 0:
        for tn in range(tn_max, 0, -8):
            if n % tn == 0:
                return tn
    return tn_max


def llama_rotary_embedding(x, position_ids, inv_freq, *, tile_rows=8192):
    """Returns (cos, sin), each of shape (B, S, dim), dtype = x.dtype."""
    B, S = position_ids.shape
    half = inv_freq.shape[0]
    dim = 2 * half
    N = B * S
    out_dtype = x.dtype
    out_bytes = jnp.dtype(out_dtype).itemsize

    tn = _pick_tile(N, dim, out_bytes, tile_rows)
    n_pad = _round_up(N, tn)
    n_tiles = n_pad // tn

    pos = position_ids.astype(jnp.float32).reshape(N, 1)
    if n_pad != N:
        pos = jnp.pad(pos, ((0, n_pad - N), (0, 0)))

    inv = inv_freq.astype(jnp.float32)
    inv_dup = jnp.concatenate([inv, inv]).reshape(1, dim)   # cos([f|f]) = [cos f|cos f]

    cos, sin = pl.pallas_call(
        _rope_kernel,
        out_shape=(
            jax.ShapeDtypeStruct((n_pad, dim), out_dtype),
            jax.ShapeDtypeStruct((n_pad, dim), out_dtype),
        ),
        grid=(n_tiles,),
        in_specs=[
            pl.BlockSpec((tn, 1), lambda i: (i, 0)),
            pl.BlockSpec((1, dim), lambda i: (0, 0)),
        ],
        out_specs=(
            pl.BlockSpec((tn, dim), lambda i: (i, 0)),
            pl.BlockSpec((tn, dim), lambda i: (i, 0)),
        ),
        compiler_params=pltpu.CompilerParams(
            dimension_semantics=("parallel",),
        ),
        cost_estimate=pl.CostEstimate(
            flops=n_pad * dim,
            transcendentals=2 * n_pad * dim,
            bytes_accessed=2 * n_pad * dim * out_bytes + n_pad * 4 + dim * 4,
        ),
    )(pos, inv_dup)

    if n_pad != N:
        cos = cos[:N]
        sin = sin[:N]
    return cos.reshape(B, S, dim), sin.reshape(B, S, dim)


def _reference(x, position_ids, inv_freq):
    # Pure-JAX mirror of the PyTorch forward.
    inv_freq_expanded = inv_freq[None, :, None].astype(jnp.float32)           # (1, half, 1)
    inv_freq_expanded = jnp.broadcast_to(
        inv_freq_expanded, (position_ids.shape[0], inv_freq.shape[0], 1))     # (B, half, 1)
    position_ids_expanded = position_ids[:, None, :].astype(jnp.float32)      # (B, 1, S)
    freqs = jnp.matmul(inv_freq_expanded, position_ids_expanded)              # (B, half, S)
    freqs = jnp.transpose(freqs, (0, 2, 1))                                   # (B, S, half)
    emb = jnp.concatenate([freqs, freqs], axis=-1)                            # (B, S, dim)
    return jnp.cos(emb).astype(x.dtype), jnp.sin(emb).astype(x.dtype)


if __name__ == "__main__":
    B, S, dim = 2, 8, 32
    key = jax.random.PRNGKey(0)
    kx, kp = jax.random.split(key)

    x = jax.random.normal(kx, (B, S, dim), dtype=jnp.float32)   # only dtype is used, like PyTorch
    position_ids = jnp.broadcast_to(jnp.arange(S, dtype=jnp.int32)[None, :], (B, S))
    inv_freq = make_inv_freq(dim, base=10000.0)

    cos, sin = llama_rotary_embedding(x, position_ids, inv_freq)
    cos, sin = jax.block_until_ready((cos, sin))

    cos_ref, sin_ref = _reference(x, position_ids, inv_freq)
    assert cos.shape == (B, S, dim) and sin.shape == (B, S, dim)
    assert cos.dtype == x.dtype and sin.dtype == x.dtype
    assert jnp.allclose(cos, cos_ref, atol=1e-5, rtol=1e-5)
    assert jnp.allclose(sin, sin_ref, atol=1e-5, rtol=1e-5)

    print("KERNEL_OK")
</pallas_src>

<mosaic_0001>
module attributes {stable_mosaic.version = 11 : i64} {
  func.func @_rope_kernel(%arg0: i32, %arg1: memref<16x1xf32, #tpu.memory_space<vmem>>, %arg2: memref<1x32xf32, #tpu.memory_space<vmem>>, %arg3: memref<16x32xf32, #tpu.memory_space<vmem>>, %arg4: memref<16x32xf32, #tpu.memory_space<vmem>>) attributes {dimension_semantics = [#tpu.dimension_semantics<parallel>], iteration_bounds = array<i64: 1>, scalar_prefetch = 0 : i64, scratch_operands = 0 : i64, tpu.core_type = #tpu.core_type<tc>, window_params = [{transform_indices = @transform_0, window_bounds = array<i64: 16, 1>}, {pipeline_mode = #tpu.pipeline_mode<synchronous>, transform_indices = @transform_1, window_bounds = array<i64: 1, 32>}, {transform_indices = @transform_2, window_bounds = array<i64: 16, 32>}, {transform_indices = @transform_3, window_bounds = array<i64: 16, 32>}]} {
    %c0 = arith.constant 0 : index
    %c0_0 = arith.constant 0 : index
    %0 = vector.load %arg1[%c0, %c0_0] : memref<16x1xf32, #tpu.memory_space<vmem>>, vector<16x1xf32>
    %c0_1 = arith.constant 0 : index
    %c0_2 = arith.constant 0 : index
    %1 = vector.load %arg2[%c0_1, %c0_2] : memref<1x32xf32, #tpu.memory_space<vmem>>, vector<1x32xf32>
    %2 = vector.broadcast %0 : vector<16x1xf32> to vector<16x32xf32>
    %3 = vector.broadcast %1 : vector<1x32xf32> to vector<16x32xf32>
    %4 = arith.mulf %2, %3 : vector<16x32xf32>
    %5 = math.cos %4 : vector<16x32xf32>
    %c0_3 = arith.constant 0 : index
    %c0_4 = arith.constant 0 : index
    %6 = vector.load %arg3[%c0_3, %c0_4] : memref<16x32xf32, #tpu.memory_space<vmem>>, vector<16x32xf32>
    tpu.vector_store %arg3[%c0_3, %c0_4], %5 {strides = array<i32>} : memref<16x32xf32, #tpu.memory_space<vmem>>, vector<16x32xf32>,
    %7 = math.sin %4 : vector<16x32xf32>
    %c0_5 = arith.constant 0 : index
    %c0_6 = arith.constant 0 : index
    %8 = vector.load %arg4[%c0_5, %c0_6] : memref<16x32xf32, #tpu.memory_space<vmem>>, vector<16x32xf32>
    tpu.vector_store %arg4[%c0_5, %c0_6], %7 {strides = array<i32>} : memref<16x32xf32, #tpu.memory_space<vmem>>, vector<16x32xf32>,
    return
  }
  func.func @transform_0(%arg0: i32) -> (i32, i32) {
    %c0_i32 = arith.constant 0 : i32
    %c0_i32_0 = arith.constant 0 : i32
    return %arg0, %c0_i32 : i32, i32
  }
  func.func @transform_1(%arg0: i32) -> (i32, i32) {
    %c0_i32 = arith.constant 0 : i32
    %c0_i32_0 = arith.constant 0 : i32
    %c0_i32_1 = arith.constant 0 : i32
    return %c0_i32, %c0_i32_0 : i32, i32
  }
  func.func @transform_2(%arg0: i32) -> (i32, i32) {
    %c0_i32 = arith.constant 0 : i32
    %c0_i32_0 = arith.constant 0 : i32
    return %arg0, %c0_i32 : i32, i32
  }
  func.func @transform_3(%arg0: i32) -> (i32, i32) {
    %c0_i32 = arith.constant 0 : i32
    %c0_i32_0 = arith.constant 0 : i32
    return %arg0, %c0_i32 : i32, i32
  }
}

</mosaic_0001>

<bundles_post_ra>
// kernel: tpu_custom_call.1
= control target key start
LH: loop header
LB: loop body
LE: loop exit
PB: predicated region body
PF: predicated region fallthrough
CT: control target
= control target key end

     0   :  { %9 = vsyncpa [#allocation3], 0  ;;  %v580_v1 = vmov 0   ;;  %s715_s0 = inlined_call_operand.vmem [shape: f32[16,1], index: 0, kind: input, shape index: {}]   ;;  %s716_s1 = inlined_call_operand.vmem [shape: f32[1,32], index: 1, kind: input, shape index: {}]   ;;  %s717_s2 = inlined_call_operand.hbm [shape: f32[16,32], index: 2, kind: output, shape index: {0}]   ;;  %s718_s3 = inlined_call_operand.hbm [shape: f32[16,32], index: 3, kind: output, shape index: {1}]  }
   0x1   :  { %v15_v0 = vld [vmem:[%s715_s0] sm:$0xff]  ;;  %523 = vset.pattern.permute.xlu0 %v580_v1  ;;  %v16_v2 = vld [vmem:[%s715_s0 + $0x8] sm:$0xff] }
   0x2   :  { %20 = vperm.xlu0 %523, %v15_v0  }
   0x3   :  { %10 = vsyncpa [#allocation5], 0  ;;  %v487_v3 = vld [vmem:[%s716_s1] ss:$0 sm:$0xff]  ;;  %v581_v24 = vmov 683565275  }
   0x4   :  { %v582_v28 = vmov 2475754826   ;;  %v583_v30 = vmov 2131351028   ;;  %v584_v32 = vmov 2102212464  }
   0x5   :  { %v585_v34 = vmov 920167782   ;;  %v586_v41 = vmov 1326507024   ;;  %s587_s0 = smov [#allocation2]   ;;  %s588_s18 = smov [#allocation4]  }
   0x6   :  { %25 = vperm.xlu0 %523, %v16_v2   ;;  %s460_s1 = sshll.u32 %s587_s0, 4  ;;  %s472_s19 = sshll.u32 %s588_s18, 4  ;;  %s461_s1 = int_to_ptr.vmem [resolvable:$true] %s460_s1  ;;  %s682_s19 = int_to_ptr.vmem [resolvable:$true] %s472_s19 }
   0x7   :  { %s532_s20 = scalar_lea.vmem %s461_s1, 256  ;;  %p537_p1 = scmp.lt.s32.totalorder %s461_s1, %s461_s1 }
   0x8   :  { %p533_p0 = scmp.ne.s32.totalorder %s461_s1, %s532_s20  ;;  %p538_p2 = scmp.lt.s32.totalorder %s532_s20, %s532_s20 }
   0xa   :  { %p539_p3 = por %p538_p2, %p537_p1 }
   0xc   :  { %p540_p4 = pnand %p539_p3, %p533_p0 }
  0x81   :  { %v21_v4 = vpop.permute.xlu0 %20 }
  0x82   :  { %v620_v5 = vmul.f32 %v487_v3, %v21_v4 }
  0x84   :  { %v36_v6 = vand.u32 2147483647, %v620_v5  ;;  %v39_v7 = vand.u32 2139095040, %v620_v5  ;;  %vm38_vm14 = vcmp.lt.s32.totalorder %v620_v5, 0 }
  0x85   :  { %v26_v8 = vpop.permute.xlu0 %25 }
  0x86   :  { %v40_v9 = vshrl.u32 %v39_v7, 23  ;;  %v624_v10 = vmul.f32 %v487_v3, %v26_v8  ;;  %v43_v11 = vand.u32 8388607, %v36_v6  ;;  %vm37_vm15 = vcmp.le.f32.partialorder %v36_v6, 0.7853982 }
  0x88   :  { %v488_v12 = vadd.s32 4294967169, %v40_v9  ;;  %v142_v13 = vand.u32 2139095040, %v624_v10  ;;  %v44_v15 = vor.u32 8388608, %v43_v11  ;;  %v139_v17 = vand.u32 2147483647, %v624_v10 }
  0x8a   :  { %v46_v14 = vadd.s32 1, %v488_v12  ;;  %v143_v16 = vshrl.u32 %v142_v13, 23  ;;  %v630_v22 = vshll.u32 %v44_v15, 8  ;;  %v146_v26 = vand.u32 8388607, %v139_v17 }
  0x8c   :  { %vm47_vm0 = vcmp.gt.s32.totalorder %v46_v14, 0  ;;  %v492_v19 = vadd.s32 4294967169, %v143_v16  ;;  %v147_v56 = vor.u32 8388608, %v146_v26 }
  0x8d   :  { %v48_v18 = vsel %vm47_vm0, %v46_v14, 0  ;;  %vm141_vm0 = vcmp.lt.s32.totalorder %v624_v10, 0 }
  0x8e   :  { %v49_v20 = vshrl.u32 %v48_v18, 5  ;;  %v50_v21 = vand.u32 31, %v48_v18  ;;  %v149_v27 = vadd.s32 1, %v492_v19  ;;  %v187_v7 = vshll.u32 %v147_v56, 8 }
  0x90   :  { %v51_v23 = vsub.s32 32, %v50_v21  ;;  %v53_v25 = vshll.u32 %v581_v24, %v50_v21  ;;  %v56_v29 = vshll.u32 %v582_v28, %v50_v21  ;;  %v59_v31 = vshll.u32 %v583_v30, %v50_v21 }
  0x91   :  { %v62_v33 = vshll.u32 %v584_v32, %v50_v21  ;;  %v65_v35 = vshll.u32 %v585_v34, %v50_v21  ;;  %vm68_vm1 = vcmp.lt.s32.totalorder %v49_v20, 1  ;;  %vm70_vm2 = vcmp.lt.s32.totalorder %v49_v20, 3 }
  0x92   :  { %v54_v36 = vshrl.u32 %v582_v28, %v51_v23  ;;  %v57_v37 = vshrl.u32 %v583_v30, %v51_v23  ;;  %v60_v38 = vshrl.u32 %v584_v32, %v51_v23  ;;  %v52_v39 = vshrl.u32 %v581_v24, %v51_v23 }
  0x93   :  { %v63_v40 = vshrl.u32 %v585_v34, %v51_v23  ;;  %v66_v42 = vshrl.u32 %v586_v41, %v51_v23  ;;  %vm150_vm3 = vcmp.gt.s32.totalorder %v149_v27, 0  ;;  %vm71_vm4 = vcmp.lt.s32.totalorder %v49_v20, 4 }
  0x94   :  { %v55_v43 = vor.u32 %v54_v36, %v53_v25  ;;  %v58_v44 = vor.u32 %v57_v37, %v56_v29  ;;  %v61_v45 = vor.u32 %v60_v38, %v59_v31  ;;  %v151_v48 = vsel %vm150_vm3, %v149_v27, 0 }
  0x95   :  { %v64_v46 = vor.u32 %v63_v40, %v62_v33  ;;  %v67_v47 = vor.u32 %v66_v42, %v65_v35  ;;  %vm69_vm5 = vcmp.lt.s32.totalorder %v49_v20, 2  ;;  %v153_v59 = vand.u32 31, %v151_v48 }
  0x96   :  { %v72_v49 = vsel %vm68_vm1, %v52_v39, %v55_v43  ;;  %v73_v50 = vsel %vm71_vm4, %v61_v45, 2102212464  ;;  %v76_v51 = vsel %vm68_vm1, %v55_v43, %v58_v44  ;;  %v80_v52 = vsel %vm68_vm1, %v58_v44, %v61_v45 }
  0x97   :  { %v74_v53 = vsel %vm70_vm2, %v58_v44, %v73_v50  ;;  %v77_v54 = vsel %vm71_vm4, %v64_v46, 920167782  ;;  %v81_v55 = vsel %vm71_vm4, %v67_v47, 1326507024  ;;  %v152_v3 = vshrl.u32 %v151_v48, 5 }
  0x98   :  { %v78_v57 = vsel %vm70_vm2, %v61_v45, %v77_v54  ;;  %v82_v58 = vsel %vm70_vm2, %v64_v46, %v81_v55  ;;  %v75_v60 = vsel %vm69_vm5, %v72_v49, %v74_v53  ;;  %v154_v4 = vsub.s32 32, %v153_v59 }
  0x99   :  { %v79_v61 = vsel %vm69_vm5, %v76_v51, %v78_v57  ;;  %v83_v62 = vsel %vm69_vm5, %v80_v52, %v82_v58  ;;  %v91_v8 = vmul.u32 %v630_v22, %v75_v60  ;;  %v156_v9 = vshll.u32 %v581_v24, %v153_v59 }
  0x9a   :  { %v643_v63 = vmul.u32.u64.low %v630_v22, %v83_v62  ;;  %v644_v0 = vmul.u32.u64.high %v630_v22, %v83_v62, %v643_v63  ;;  %v647_v1 = vmul.u32.u64.low %v630_v22, %v79_v61  ;;  %v648_v2 = vmul.u32.u64.high %v630_v22, %v79_v61, %v647_v1 }
  0x9b   :  { %v159_v11 = vshll.u32 %v582_v28, %v153_v59  ;;  %v162_v12 = vshll.u32 %v583_v30, %v153_v59  ;;  %v157_v13 = vshrl.u32 %v582_v28, %v154_v4  ;;  %v160_v14 = vshrl.u32 %v583_v30, %v154_v4 }
  0x9c   :  { %v163_v15 = vshrl.u32 %v584_v32, %v154_v4  ;;  %v165_v16 = vshll.u32 %v584_v32, %v153_v59  ;;  %vm93_vm6 = vc.u32 %v644_v0, %v647_v1  ;;  %v94_v18 = vadd.s32 1, %v648_v2 }
  0x9d   :  { %v166_v19 = vshrl.u32 %v585_v34, %v154_v4  ;;  %v168_v20 = vshll.u32 %v585_v34, %v153_v59  ;;  %v158_v21 = vor.u32 %v157_v13, %v156_v9  ;;  %v161_v23 = vor.u32 %v160_v14, %v159_v11 }
  0x9e   :  { %v164_v25 = vor.u32 %v163_v15, %v162_v12  ;;  %v169_v26 = vshrl.u32 %v586_v41, %v154_v4  ;;  %v95_v22 = vsel %vm93_vm6, %v94_v18, %v648_v2  ;;  %vm171_vm7 = vcmp.lt.s32.totalorder %v152_v3, 1 }
  0x9f   :  { %v167_v27 = vor.u32 %v166_v19, %v165_v16  ;;  %vm174_vm8 = vcmp.lt.s32.totalorder %v152_v3, 4  ;;  %v96_v28 = vadd.s32 %v95_v22, %v91_v8  ;;  %vm173_vm9 = vcmp.lt.s32.totalorder %v152_v3, 3 }
  0xa0   :  { %v170_v29 = vor.u32 %v169_v26, %v168_v20  ;;  %v176_v30 = vsel %vm174_vm8, %v164_v25, 2102212464  ;;  %v155_v31 = vshrl.u32 %v581_v24, %v154_v4  ;;  %v179_v32 = vsel %vm171_vm7, %v158_v21, %v161_v23 }
  0xa1   :  { %v180_v33 = vsel %vm174_vm8, %v167_v27, 920167782  ;;  %v183_v35 = vsel %vm171_vm7, %v161_v23, %v164_v25  ;;  %v97_v36 = vadd.s32 536870912, %v96_v28  ;;  %vm172_vm10 = vcmp.lt.s32.totalorder %v152_v3, 2 }
  0xa2   :  { %v181_v34 = vsel %vm173_vm9, %v164_v25, %v180_v33  ;;  %v184_v37 = vsel %vm174_vm8, %v170_v29, 1326507024  ;;  %v175_v38 = vsel %vm171_vm7, %v155_v31, %v158_v21  ;;  %v177_v39 = vsel %vm173_vm9, %v161_v23, %v176_v30 }
  0xa3   :  { %v182_v40 = vsel %vm172_vm10, %v179_v32, %v181_v34  ;;  %v185_v41 = vsel %vm173_vm9, %v167_v27, %v184_v37  ;;  %v98_v42 = vshrl.u32 %v97_v36, 30  ;;  %v178_v48 = vsel %vm172_vm10, %v175_v38, %v177_v39 }
  0xa4   :  { %v186_v43 = vsel %vm172_vm10, %v183_v35, %v185_v41  ;;  %v658_v44 = vmul.u32.u64.low %v187_v7, %v182_v40  ;;  %v659_v45 = vmul.u32.u64.high %v187_v7, %v182_v40, %v658_v44  ;;  %v194_v51 = vmul.u32 %v187_v7, %v178_v48 }
  0xa5   :  { %v661_v46 = vmul.u32.u64.low %v187_v7, %v186_v43  ;;  %v662_v47 = vmul.u32.u64.high %v187_v7, %v186_v43, %v661_v46  ;;  %v99_v24 = vshll.u32 %v98_v42, 30  ;;  %v92_v63 = vadd.s32 %v647_v1, %v644_v0 }
  0xa6   :  { %v197_v50 = vadd.s32 1, %v659_v45  ;;  %v122_v21 = vsub.s32 4, %v98_v42  ;;  %vm140_vm1 = vcmp.le.f32.partialorder %v139_v17, 0.7853982  ;;  %vm242_vm3 = vcmask 261120  }
  0xa7   :  { %v100_v49 = vsub.s32 %v96_v28, %v99_v24  ;;  %vm196_vm11 = vc.u32 %v662_v47, %v658_v44  ;;  %v195_v0 = vadd.s32 %v658_v44, %v662_v47  ;;  %vm128_vm9 = vweird.f32 %v620_v5 }
  0xa8   :  { %v198_v53 = vsel %vm196_vm11, %v197_v50, %v659_v45  ;;  %v123_v30 = vsel %vm38_vm14, %v122_v21, %v98_v42 }
  0xa9   :  { %v102_v52 = vsub.s32 0, %v100_v49  ;;  %v199_v54 = vadd.s32 %v198_v53, %v194_v51  ;;  %v125_v36 = vsel %vm37_vm15, 0, %v123_v30 }
  0xaa   :  { %v338_v38 = vadd.s32 3, %v125_v36  ;;  %v129_v43 = vand.u32 3, %v125_v36 }
  0xab   :  { %v489_v55 = vmin.u32 %v102_v52, %v100_v49  ;;  %v200_v56 = vadd.s32 536870912, %v199_v54 }
  0xac   :  { %v339_v6 = vand.u32 3, %v338_v38  ;;  %vm134_vm2 = vcmp.eq.s32.totalorder %v129_v43, 2  ;;  %vm131_vm5 = vcmp.eq.s32.totalorder %v129_v43, 0  ;;  %vm130_vm7 = vcmp.lt.s32.totalorder %v129_v43, 2 }
  0xad   :  { %v104_v57 = vclz %v489_v55  ;;  %v201_v58 = vshrl.u32 %v200_v56, 30 }
  0xae   :  { %vm344_vm4 = vcmp.eq.s32.totalorder %v339_v6, 2  ;;  %vm341_vm6 = vcmp.eq.s32.totalorder %v339_v6, 0  ;;  %vm340_vm8 = vcmp.lt.s32.totalorder %v339_v6, 2 }
  0xaf   :  { %v490_v59 = vadd.s32 4294967294, %v104_v57  ;;  %v202_v60 = vshll.u32 %v201_v58, 30  ;;  %v225_v40 = vsub.s32 4, %v201_v58 }
  0xb1   :  { %vm491_vm12 = vcmp.lt.s32.totalorder %v490_v59, 0  ;;  %v203_v62 = vsub.s32 %v199_v54, %v202_v60  ;;  %v226_v44 = vsel %vm141_vm0, %v225_v40, %v201_v58 }
  0xb2   :  { %v107_v61 = vsel %vm491_vm12, 0, %v490_v59 }
  0xb3   :  { %v108_v2 = vsub.s32 32, %v107_v61  ;;  %v112_v3 = vsub.s32 4294967266, %v107_v61  ;;  %v205_v4 = vsub.s32 0, %v203_v62  ;;  %v109_v7 = vshll.u32 %v100_v49, %v107_v61 }
  0xb4   :  { %v228_v49 = vsel %vm140_vm1, 0, %v226_v44 }
  0xb5   :  { %v110_v8 = vshrl.u32 %v92_v63, %v108_v2  ;;  %v113_v9 = vadd.s32 127, %v112_v3  ;;  %v493_v11 = vmin.u32 %v205_v4, %v203_v62  ;;  %v442_v55 = vadd.s32 3, %v228_v49 }
  0xb6   :  { %v232_v58 = vand.u32 3, %v228_v49 }
  0xb7   :  { %v111_v12 = vor.u32 %v110_v8, %v109_v7  ;;  %v114_v13 = vshll.u32 %v113_v9, 23  ;;  %v207_v14 = vclz %v493_v11  ;;  %v443_v59 = vand.u32 3, %v442_v55 }
  0xb8   :  { %vm237_vm10 = vcmp.eq.s32.totalorder %v232_v58, 2  ;;  %vm234_vm12 = vcmp.eq.s32.totalorder %v232_v58, 0 }
  0xb9   :  { %v115_v15 = vor.u32 4788187, %v114_v13  ;;  %v494_v16 = vadd.s32 4294967294, %v207_v14  ;;  %v118_v19 = vcvt.s32.f32 %v111_v12  ;;  %vm448_vm11 = vcmp.eq.s32.totalorder %v443_v59, 2 }
  0xbb   :  { %v116_v18 = vand.u32 2147483647, %v115_v15  ;;  %vm495_vm13 = vcmp.lt.s32.totalorder %v494_v16, 0 }
  0xbc   :  { %v210_v23 = vsel %vm495_vm13, 0, %v494_v16  ;;  %vm445_vm13 = vcmp.eq.s32.totalorder %v443_v59, 0 }
  0xbd   :  { %v119_v20 = vmul.f32 %v118_v19, %v116_v18  ;;  %v211_v1 = vsub.s32 32, %v210_v23  ;;  %v215_v25 = vsub.s32 4294967266, %v210_v23  ;;  %v212_v22 = vshll.u32 %v203_v62, %v210_v23 }
  0xbf   :  { %v120_v26 = vxor.u32 2147483648, %v119_v20  ;;  %v213_v27 = vshrl.u32 %v195_v0, %v211_v1  ;;  %v216_v28 = vadd.s32 127, %v215_v25 }
  0xc1   :  { %v121_v29 = vsel %vm38_vm14, %v120_v26, %v119_v20  ;;  %v214_v32 = vor.u32 %v213_v27, %v212_v22  ;;  %v217_v33 = vshll.u32 %v216_v28, 23  ;;  %vm233_vm14 = vcmp.lt.s32.totalorder %v232_v58, 2 }
  0xc2   :  { %v124_v31 = vsel %vm37_vm15, %v620_v5, %v121_v29  ;;  %vm444_vm15 = vcmp.lt.s32.totalorder %v443_v59, 2 }
  0xc3   :  { %524 = vcosq.f32 %v124_v31  ;;  %v218_v35 = vor.u32 4788187, %v217_v33  ;;  %v221_v37 = vcvt.s32.f32 %v214_v32 }
  0xc4   :  { %526 = vsinq.f32 %v124_v31 }
  0xc5   :  { %v219_v34 = vand.u32 2147483647, %v218_v35 }
  0xc7   :  { %v222_v39 = vmul.f32 %v221_v37, %v219_v34 }
  0xc9   :  { %v223_v41 = vxor.u32 2147483648, %v222_v39 }
  0xcb   :  { %v224_v42 = vsel %vm141_vm0, %v223_v41, %v222_v39  ;;  %vm231_vm0 = vweird.f32 %v624_v10 }
  0xcc   :  { %v227_v46 = vsel %vm140_vm1, %v624_v10, %v224_v42 }
  0xcd   :  { %v525_v45 = vpop.eup %524  ;;  %528 = vcosq.f32 %v227_v46 }
  0xce   :  { %v527_v47 = vpop.eup %526  ;;  %v135_v24 = vxor.u32 2147483648, %v525_v45  ;;  %530 = vsinq.f32 %v227_v46 }
  0xcf   :  { %v132_v48 = vxor.u32 2147483648, %v527_v47 }
  0xd0   :  { %v136_v50 = vsel %vm134_vm2, %v135_v24, %v527_v47  ;;  %v346_v51 = vsel %vm344_vm4, %v135_v24, %v527_v47 }
  0xd1   :  { %v133_v17 = vsel %vm131_vm5, %v525_v45, %v132_v48  ;;  %v343_v52 = vsel %vm341_vm6, %v525_v45, %v132_v48 }
  0xd2   :  { %v137_v53 = vsel %vm130_vm7, %v133_v17, %v136_v50  ;;  %v347_v54 = vsel %vm340_vm8, %v343_v52, %v346_v51 }
  0xd3   :  { %v138_v56 = vsel %vm128_vm9, nan, %v137_v53  ;;  %v348_v57 = vsel %vm128_vm9, nan, %v347_v54 }
  0xd4   :  { %243 = vst.msk [vmem:[#allocation2] sm:$0xff] %vm242_vm3, %v138_v56  ;;  %453 = vst.msk [vmem:[#allocation4] sm:$0xff] %vm242_vm3, %v348_v57 }
  0xd7   :  { %v529_v60 = vpop.eup %528 }
  0xd8   :  { %v531_v61 = vpop.eup %530  ;;  %v238_v62 = vxor.u32 2147483648, %v529_v60 }
  0xd9   :  { %v235_v63 = vxor.u32 2147483648, %v531_v61 }
  0xda   :  { %v239_v5 = vsel %vm237_vm10, %v238_v62, %v531_v61  ;;  %v450_v2 = vsel %vm448_vm11, %v238_v62, %v531_v61 }
  0xdb   :  { %v236_v3 = vsel %vm234_vm12, %v529_v60, %v235_v63  ;;  %v447_v4 = vsel %vm445_vm13, %v529_v60, %v235_v63 }
  0xdc   :  { %v240_v7 = vsel %vm233_vm14, %v236_v3, %v239_v5  ;;  %v451_v8 = vsel %vm444_vm15, %v447_v4, %v450_v2 }
  0xdd   :  { %v241_v9 = vsel %vm231_vm0, nan, %v240_v7  ;;  %v452_v11 = vsel %vm231_vm0, nan, %v451_v8 }
  0xde   :  { %244 = vst.msk [vmem:[#allocation2 + $0x8] sm:$0xff] %vm242_vm3, %v241_v9  ;;  %454 = vst.msk [vmem:[#allocation4 + $0x8] sm:$0xff] %vm242_vm3, %v452_v11 }
  0xdf   :  { %543 = shalt.err (!%p540_p4)
}
  0xe0   :  { %s544_s23 = scalar_lea.hbm %s717_s2, 256 }
  0xe1   :  { %p545_p5 = scmp.ne.s32.totalorder %s717_s2, %s544_s23  ;;  %p548_p6 = scmp.lt.u32.totalorder %s544_s23, %s717_s2 }
  0xe3   :  { %p550_p7 = pnand %p548_p6, %p545_p5 }
  0xe5   :  { %553 = shalt.err (!%p550_p7)
}
  0xe6   :  { %s589_s28 = smov 128   ;;  %s590_s29 = smov 8  }
  0xe7   :  { %466 = dma.vmem_to_hbm [thread:$0]  %s461_s1, 256, %s717_s2, [#allocation3], %s589_s28, %s589_s28, %s590_s29  }
  0xe8   :  { %s554_s5 = scalar_lea.vmem %s682_s19, 256  ;;  %p559_p9 = scmp.lt.s32.totalorder %s682_s19, %s682_s19 }
  0xe9   :  { %p555_p8 = scmp.ne.s32.totalorder %s682_s19, %s554_s5  ;;  %p560_p10 = scmp.lt.s32.totalorder %s554_s5, %s554_s5 }
  0xeb   :  { %p561_p11 = por %p560_p10, %p559_p9 }
  0xed   :  { %p562_p12 = pnand %p561_p11, %p555_p8 }
  0xef   :  { %565 = shalt.err (!%p562_p12)
}
  0xf0   :  { %s566_s8 = scalar_lea.hbm %s718_s3, 256 }
  0xf1   :  { %p567_p13 = scmp.ne.s32.totalorder %s718_s3, %s566_s8  ;;  %p570_p0 = scmp.lt.u32.totalorder %s566_s8, %s718_s3 }
  0xf3   :  { %p572_p1 = pnand %p570_p0, %p567_p13 }
  0xf5   :  { %575 = shalt.err (!%p572_p1)
}
  0xf6   :  { %478 = dma.vmem_to_hbm [thread:$0]  %s682_s19, 256, %s718_s3, [#allocation5], %s589_s28, %s589_s28, %s590_s29  }
  0xf7   :  { %576 = dma.done.wait [#allocation3], 256  }
  0xf8   :  { %577 = vsyncadd [#allocation3], 4294967040 }
  0xf9   :  { %578 = dma.done.wait [#allocation5], 256  }
  0xfa   :  { %579 = vsyncadd [#allocation5], 4294967040 }
  0xfb   :  { %485 = vsyncpa [#allocation3], 1 }
  0xfc   :  { %486 = vsyncpa [#allocation5], 1 }

</bundles_post_ra>
